<compile_context>
chip_gen: v7x
topology: tpu7x:2x2x1
jax: 0.10.0
libtpu: 0.0.40
codegen_flags: <defaults>
</compile_context>

<pallas_src>
import jax
import jax.numpy as jnp
from jax.experimental import pallas as pl
from jax.experimental.pallas import tpu as pltpu


# -----------------------------------------------------------------------------
# Pallas kernel: whole MLP forward in one body (everything VMEM/SMEM-resident).
# -----------------------------------------------------------------------------
def age_mlp2_kernel(x_ref, w1_ref, b1_ref, w2_ref, b2_ref, w3_ref, b3_ref,
                    out_ref):
    """x_ref   : [B, F_in] f32
       w1_ref  : [F_in, H] bf16  (fc1 weight with bn1 folded in)
       b1_ref  : [1, H]    f32   (fc1 bias  with bn1 folded in)
       w2_ref  : [H, H]    bf16
       b2_ref  : [1, H]    f32
       w3_ref  : [1, H]    f32   (fc3 weight as a lane-dense row)
       b3_ref  : [1, 1]    f32   (SMEM scalar)
       out_ref : [B, 1]    f32
    """
    # fc1 + folded BN1: bf16 MXU matmul, f32 accumulate, f32 bias/ReLU.
    x_bf16 = x_ref[...].astype(jnp.bfloat16)
    h1 = jnp.dot(x_bf16, w1_ref[...],
                 preferred_element_type=jnp.float32) + b1_ref[...]
    h1 = jnp.maximum(h1, 0.0)                      # ReLU (drop1 = eval no-op)

    # fc2: bf16 MXU matmul, f32 accumulate, f32 bias/ReLU.
    h2 = jnp.dot(h1.astype(jnp.bfloat16), w2_ref[...],
                 preferred_element_type=jnp.float32) + b2_ref[...]
    h2 = jnp.maximum(h2, 0.0)                      # ReLU (drop2 = eval no-op)

    # fc3 (output width 1): VPU multiply + XLU cross-lane reduce instead of an
    # N=1 MXU matmul (avoids a full vmatmul push/pop for 1/256 of the columns).
    y = jnp.sum(h2 * w3_ref[...], axis=-1, keepdims=True) + b3_ref[0, 0]
    out_ref[...] = y


# -----------------------------------------------------------------------------
# Wrapper (gridless: fixed-overhead-bound at these sizes).
# -----------------------------------------------------------------------------
def age_mlp2_forward(folded, x):
    """folded: output of fold_bn1_into_fc1. x: [B, F_in] f32."""
    B = x.shape[0]
    vmem = pl.BlockSpec(memory_space=pltpu.MemorySpace.VMEM)
    smem = pl.BlockSpec(memory_space=pltpu.MemorySpace.SMEM)
    y = pl.pallas_call(
        age_mlp2_kernel,
        out_shape=jax.ShapeDtypeStruct((B, 1), jnp.float32),
        in_specs=[vmem,          # x
                  vmem, vmem,    # w1f, b1f
                  vmem, vmem,    # w2,  b2
                  vmem, smem],   # w3 row, b3 scalar
        out_specs=vmem,
    )(x, folded["w1f"], folded["b1f"], folded["w2"], folded["b2"],
      folded["w3r"], folded["b3s"])
    return jnp.squeeze(y, axis=-1)


def fold_bn1_into_fc1(params, eps=1e-5):
    """One-time parameter preparation (outside the per-call critical path).

    bn1(fc1(x)) == x @ (W1 * s) + ((b1 - mean) * s + beta),  s = gamma/sqrt(var+eps).
    Matmul weights are cast to bf16 (MXU-native, half the DMA bytes); all bias /
    elementwise operands stay f32 so v5e (no bf16 VPU) keeps a pure f32 VPU path.
    """
    s = params["bn_gamma"] / jnp.sqrt(params["bn_var"] + eps)
    w1f = (params["w1"] * s[None, :]).astype(jnp.bfloat16)
    b1f = ((params["b1"] - params["bn_mean"]) * s + params["bn_beta"])
    return {
        "w1f": w1f,                                              # [F, H] bf16
        "b1f": b1f[None, :].astype(jnp.float32),                 # [1, H] f32
        "w2":  params["w2"].astype(jnp.bfloat16),                # [H, H] bf16
        "b2":  params["b2"][None, :].astype(jnp.float32),        # [1, H] f32
        "w3r": params["w3"].reshape(1, -1).astype(jnp.float32),  # [1, H] f32 row
        "b3s": params["b3"].reshape(1, 1).astype(jnp.float32),   # [1, 1] f32 (SMEM)
    }


# -----------------------------------------------------------------------------
# Pure-JAX references
# -----------------------------------------------------------------------------
def age_mlp2_ref(params, x, eps=1e-5):
    """Full-f32 reference matching the PyTorch eval-mode forward."""
    p = params
    z = x @ p["w1"] + p["b1"]
    z = (z - p["bn_mean"]) / jnp.sqrt(p["bn_var"] + eps) * p["bn_gamma"] + p["bn_beta"]
    h1 = jnp.maximum(z, 0.0)
    h2 = jnp.maximum(h1 @ p["w2"] + p["b2"], 0.0)
    y = h2 @ p["w3"] + p["b3"][None, :]
    return jnp.squeeze(y, axis=-1)


def age_mlp2_folded_ref(folded, x):
    """Reference using the exact same folded / bf16-cast params as the kernel
    (isolates kernel numerics from weight-quantization error)."""
    h1 = jnp.maximum(
        jnp.dot(x.astype(jnp.bfloat16), folded["w1f"],
                preferred_element_type=jnp.float32) + folded["b1f"], 0.0)
    h2 = jnp.maximum(
        jnp.dot(h1.astype(jnp.bfloat16), folded["w2"],
                preferred_element_type=jnp.float32) + folded["b2"], 0.0)
    y = jnp.sum(h2 * folded["w3r"], axis=-1, keepdims=True) + folded["b3s"][0, 0]
    return jnp.squeeze(y, axis=-1)


# -----------------------------------------------------------------------------
# Main
# -----------------------------------------------------------------------------
if __name__ == "__main__":
    B, in_dim, hidden1 = 16, 8, 256   # hidden1=256 is the module default

    key = jax.random.PRNGKey(0)
    ks = jax.random.split(key, 11)

    def kaiming(k, shape):
        fan_in = shape[0]
        return jax.random.normal(k, shape, jnp.float32) * (2.0 / fan_in) ** 0.5

    params = {
        # fc1 / bn1 (bn uses running stats: eval mode)
        "w1": kaiming(ks[0], (in_dim, hidden1)),
        "b1": 0.01 * jax.random.normal(ks[1], (hidden1,), jnp.float32),
        "bn_gamma": 1.0 + 0.1 * jax.random.normal(ks[2], (hidden1,), jnp.float32),
        "bn_beta": 0.1 * jax.random.normal(ks[3], (hidden1,), jnp.float32),
        "bn_mean": 0.1 * jax.random.normal(ks[4], (hidden1,), jnp.float32),
        "bn_var": jax.random.uniform(ks[5], (hidden1,), jnp.float32, 0.5, 1.5),
        # fc2  (bn2 exists in __init__ but is NOT applied in forward)
        "w2": kaiming(ks[6], (hidden1, hidden1)),
        "b2": 0.01 * jax.random.normal(ks[7], (hidden1,), jnp.float32),
        # fc3
        "w3": kaiming(ks[8], (hidden1, 1)),
        "b3": 0.01 * jax.random.normal(ks[9], (1,), jnp.float32),
    }

    x = jax.random.normal(ks[10], (B, in_dim), jnp.float32)

    folded = fold_bn1_into_fc1(params)
    out = age_mlp2_forward(folded, x)
    out = jax.block_until_ready(out)
    assert out.shape == (B,), out.shape

    # Tight check: kernel vs pure-JAX path using identical bf16-cast weights.
    ref_folded = age_mlp2_folded_ref(folded, x)
    assert jnp.allclose(out, ref_folded, rtol=2e-3, atol=2e-3), (out, ref_folded)

    # Loose check: kernel vs full-f32 PyTorch-semantics reference
    # (tolerance accounts for bf16 weight quantization of the two matmuls).
    ref_f32 = age_mlp2_ref(params, x)
    assert jnp.allclose(out, ref_f32, rtol=3e-2, atol=3e-2), (out, ref_f32)

    print("KERNEL_OK")
</pallas_src>

<mosaic_0001>
module attributes {stable_mosaic.version = 11 : i64} {
  func.func @age_mlp2_kernel(%arg0: memref<16x8xf32, #tpu.memory_space<vmem>>, %arg1: memref<8x256xbf16, #tpu.memory_space<vmem>>, %arg2: memref<1x256xf32, #tpu.memory_space<vmem>>, %arg3: memref<256x256xbf16, #tpu.memory_space<vmem>>, %arg4: memref<1x256xf32, #tpu.memory_space<vmem>>, %arg5: memref<1x256xf32, #tpu.memory_space<vmem>>, %arg6: memref<1x1xf32, #tpu.memory_space<smem>>, %arg7: memref<16x1xf32, #tpu.memory_space<vmem>>) attributes {dimension_semantics = [], scalar_prefetch = 0 : i64, scratch_operands = 0 : i64, tpu.core_type = #tpu.core_type<tc>} {
    %c0 = arith.constant 0 : index
    %c0_0 = arith.constant 0 : index
    %0 = vector.load %arg0[%c0, %c0_0] : memref<16x8xf32, #tpu.memory_space<vmem>>, vector<16x8xf32>
    %1 = arith.truncf %0 : vector<16x8xf32> to vector<16x8xbf16>
    %c0_1 = arith.constant 0 : index
    %c0_2 = arith.constant 0 : index
    %2 = vector.load %arg1[%c0_1, %c0_2] : memref<8x256xbf16, #tpu.memory_space<vmem>>, vector<8x256xbf16>
    %cst = arith.constant dense<0.000000e+00> : vector<16x256xf32>
    %3 = tpu.matmul %1, %2, %cst {dimension_numbers = #tpu.dot_dimension_numbers<[1], [0], [0], [1], [0, 0, 1, 1], [], []>} : vector<16x8xbf16>, vector<8x256xbf16>, vector<16x256xf32> -> vector<16x256xf32>
    %c0_3 = arith.constant 0 : index
    %c0_4 = arith.constant 0 : index
    %4 = vector.load %arg2[%c0_3, %c0_4] : memref<1x256xf32, #tpu.memory_space<vmem>>, vector<1x256xf32>
    %5 = vector.broadcast %4 : vector<1x256xf32> to vector<16x256xf32>
    %6 = arith.addf %3, %5 : vector<16x256xf32>
    %cst_5 = arith.constant 0.000000e+00 : f32
    %7 = vector.broadcast %cst_5 : f32 to vector<16x256xf32>
    %8 = arith.maximumf %6, %7 : vector<16x256xf32>
    %9 = arith.truncf %8 : vector<16x256xf32> to vector<16x256xbf16>
    %c0_6 = arith.constant 0 : index
    %c0_7 = arith.constant 0 : index
    %10 = vector.load %arg3[%c0_6, %c0_7] : memref<256x256xbf16, #tpu.memory_space<vmem>>, vector<256x256xbf16>
    %cst_8 = arith.constant dense<0.000000e+00> : vector<16x256xf32>
    %11 = tpu.matmul %9, %10, %cst_8 {dimension_numbers = #tpu.dot_dimension_numbers<[1], [0], [0], [1], [0, 0, 1, 1], [], []>} : vector<16x256xbf16>, vector<256x256xbf16>, vector<16x256xf32> -> vector<16x256xf32>
    %c0_9 = arith.constant 0 : index
    %c0_10 = arith.constant 0 : index
    %12 = vector.load %arg4[%c0_9, %c0_10] : memref<1x256xf32, #tpu.memory_space<vmem>>, vector<1x256xf32>
    %13 = vector.broadcast %12 : vector<1x256xf32> to vector<16x256xf32>
    %14 = arith.addf %11, %13 : vector<16x256xf32>
    %cst_11 = arith.constant 0.000000e+00 : f32
    %15 = vector.broadcast %cst_11 : f32 to vector<16x256xf32>
    %16 = arith.maximumf %14, %15 : vector<16x256xf32>
    %c0_12 = arith.constant 0 : index
    %c0_13 = arith.constant 0 : index
    %17 = vector.load %arg5[%c0_12, %c0_13] : memref<1x256xf32, #tpu.memory_space<vmem>>, vector<1x256xf32>
    %18 = vector.broadcast %17 : vector<1x256xf32> to vector<16x256xf32>
    %19 = arith.mulf %16, %18 : vector<16x256xf32>
    %cst_14 = arith.constant dense<0.000000e+00> : vector<16xf32>
    %20 = vector.multi_reduction <add>, %19, %cst_14 [1] : vector<16x256xf32> to vector<16xf32>
    %21 = vector.shape_cast %20 : vector<16xf32> to vector<16x1xf32>
    %c0_15 = arith.constant 0 : index
    %c0_16 = arith.constant 0 : index
    %22 = memref.load %arg6[%c0_15, %c0_16] : memref<1x1xf32, #tpu.memory_space<smem>>
    %23 = vector.broadcast %22 : f32 to vector<16x1xf32>
    %24 = arith.addf %21, %23 : vector<16x1xf32>
    %c0_17 = arith.constant 0 : index
    %c0_18 = arith.constant 0 : index
    %25 = vector.load %arg7[%c0_17, %c0_18] : memref<16x1xf32, #tpu.memory_space<vmem>>, vector<16x1xf32>
    tpu.vector_store %arg7[%c0_17, %c0_18], %24 {strides = array<i32>} : memref<16x1xf32, #tpu.memory_space<vmem>>, vector<16x1xf32>,
    return
  }
}

</mosaic_0001>

<bundles_post_ra>
// kernel: tpu_custom_call.1
= control target key start
LH: loop header
LB: loop body
LE: loop exit
PB: predicated region body
PF: predicated region fallthrough
CT: control target
= control target key end

     0   :  { %13 = vsyncpa [#allocation4], 0  ;;  %s522_s24 = smov [#allocation3]   ;;  %s605_s0 = inlined_call_operand.vmem [shape: f32[16,8], index: 0, kind: input, shape index: {}]   ;;  %s606_s1 = inlined_call_operand.vmem [shape: bf16[8,256], index: 1, kind: input, shape index: {}]   ;;  %s607_s2 = inlined_call_operand.vmem [shape: f32[1,256], index: 2, kind: input, shape index: {}]   ;;  %s608_s3 = inlined_call_operand.hbm [shape: bf16[256,256], index: 3, kind: input, shape index: {}]   ;;  %s609_s4 = inlined_call_operand.vmem [shape: f32[1,256], index: 4, kind: input, shape index: {}]   ;;  %s610_s5 = inlined_call_operand.vmem [shape: f32[1,256], index: 5, kind: input, shape index: {}]   ;;  %s611_s6 = inlined_call_operand.<no memory space> [shape: f32[1,1], index: 6, kind: input, shape index: {}]   ;;  %s612_s7 = inlined_call_operand.vmem [shape: f32[16,1], index: 7, kind: output, shape index: {}]  }
   0x1   :  { %s25_s25 = sshll.u32 %s522_s24, 4  ;;  %s498_s28 = scalar_lea.hbm %s608_s3, 4096  ;;  %s26_s25 = int_to_ptr.vmem [resolvable:$true] %s25_s25 }
   0x2   :  { %p499_p0 = scmp.ne.s32.totalorder %s608_s3, %s498_s28  ;;  %p502_p1 = scmp.lt.u32.totalorder %s498_s28, %s608_s3 }
   0x4   :  { %p504_p2 = pnand %p502_p1, %p499_p0 }
   0x6   :  { %507 = shalt.err (!%p504_p2)
}
   0x7   :  { %s508_s10 = scalar_lea.vmem %s26_s25, 4096  ;;  %p513_p4 = scmp.lt.s32.totalorder %s26_s25, %s26_s25 }
   0x8   :  { %p509_p3 = scmp.ne.s32.totalorder %s26_s25, %s508_s10  ;;  %p514_p5 = scmp.lt.s32.totalorder %s508_s10, %s508_s10 }
   0xa   :  { %p515_p6 = por %p514_p5, %p513_p4 }
   0xc   :  { %p516_p7 = pnand %p515_p6, %p509_p3 }
   0xe   :  { %519 = shalt.err (!%p516_p7)
}
   0xf   :  { %s523_s11 = smov 128   ;;  %s524_s12 = smov 8  }
  0x10   :  { %31 = dma.hbm_to_vmem [thread:$0]  %s608_s3, 4096, %s26_s25, [#allocation4], %s523_s11, %s523_s11, %s524_s12  }
  0x11   :  { %520 = dma.done.wait [#allocation4], 4096  }
  0x12   :  { %521 = vsyncadd [#allocation4], 4294963200  ;;  %v525_v0 = vmov 0   ;;  %v45_v1 = vld [vmem:[%s606_s1] sm:$0xff]  ;;  %vm67_vm0 = vcmask 1043456   ;;  %v43_v3 = vld [vmem:[%s605_s0 + $0x8] sm:$0xff]  ;;  %v48_v40 = vlaneseq }
  0x13   :  { %106 = vmatprep.mubr.bf16.mxu0 %v525_v0  ;;  %v42_v2 = vld [vmem:[%s605_s0] sm:$0xff]  ;;  %v409_v4 = vcombine.high %v45_v1, %v45_v1  ;;  %v408_v5 = vcombine.low %v45_v1, %v45_v1  ;;  %v453_v10 = vld [vmem:[#allocation3 + $0x14] ss:$8 sps:$4 sm:$0xff]   ;;  %vm63_vm1 = vcmask 64512   ;;  %v455_v11 = vld [vmem:[#allocation3 + $0x10] ss:$8 sps:$4 sm:$0xff]  }
  0x14   :  { %v450_v6 = vld [vmem:[#allocation3 + $0x4] ss:$8 sps:$4 sm:$0xff]   ;;  %v452_v7 = vld [vmem:[#allocation3] ss:$8 sps:$4 sm:$0xff]   ;;  %v44_v9 = vpack.c.bf16 %v43_v3, %v42_v2  ;;  %v459_v14 = vld [vmem:[#allocation3 + $0x34] ss:$8 sps:$4 sm:$0xff]  }
  0x15   :  { %410 = vmatprep.subr.msk.bf16.mxu0 %vm67_vm0, %v409_v4  ;;  %v69_v8 = vsel %vm67_vm0, %v408_v5, 0  ;;  %327 = vmatprep.subr.bf16.mxu1 %v450_v6  ;;  %v456_v12 = vld [vmem:[#allocation3 + $0x24] ss:$8 sps:$4 sm:$0xff]   ;;  %v458_v13 = vld [vmem:[#allocation3 + $0x20] ss:$8 sps:$4 sm:$0xff]   ;;  %v49_v41 = vshrl.u32 %v48_v40, 7 }
  0x16   :  { %75 = vmatpush1.bf16.msra.mxu0 %v69_v8  ;;  %328 = vmatpush1.bf16.msra.mxu1 %v452_v7  ;;  %v461_v15 = vld [vmem:[#allocation3 + $0x30] ss:$8 sps:$4 sm:$0xff]   ;;  %v462_v16 = vld [vmem:[#allocation3 + $0x44] ss:$8 sps:$4 sm:$0xff]   ;;  %v464_v17 = vld [vmem:[#allocation3 + $0x40] ss:$8 sps:$4 sm:$0xff]  }
  0x17   :  { %329 = vmatprep.subr.bf16.mxu1 %v453_v10  ;;  %v465_v18 = vld [vmem:[#allocation3 + $0x54] ss:$8 sps:$4 sm:$0xff]   ;;  %v467_v19 = vld [vmem:[#allocation3 + $0x50] ss:$8 sps:$4 sm:$0xff]   ;;  %v468_v20 = vld [vmem:[#allocation3 + $0x64] ss:$8 sps:$4 sm:$0xff]  }
  0x18   :  { %v470_v21 = vld [vmem:[#allocation3 + $0x60] ss:$8 sps:$4 sm:$0xff]   ;;  %v471_v22 = vld [vmem:[#allocation3 + $0x74] ss:$8 sps:$4 sm:$0xff]   ;;  %v473_v23 = vld [vmem:[#allocation3 + $0x70] ss:$8 sps:$4 sm:$0xff]  }
  0x19   :  { %411 = vmatmul.mubr.msk.bf16.vlgmr.msra.gmra.mrb[0].mxu0 %vm63_vm1, %v44_v9  ;;  %v474_v24 = vld [vmem:[#allocation3 + $0x84] ss:$8 sps:$4 sm:$0xff]   ;;  %v476_v25 = vld [vmem:[#allocation3 + $0x80] ss:$8 sps:$4 sm:$0xff]   ;;  %v477_v26 = vld [vmem:[#allocation3 + $0x94] ss:$8 sps:$4 sm:$0xff]  }
  0x1a   :  { %330 = vmatpush1.bf16.msra.mxu1 %v455_v11  ;;  %v479_v27 = vld [vmem:[#allocation3 + $0x90] ss:$8 sps:$4 sm:$0xff]   ;;  %v480_v28 = vld [vmem:[#allocation3 + $0xa4] ss:$8 sps:$4 sm:$0xff]   ;;  %v482_v29 = vld [vmem:[#allocation3 + $0xa0] ss:$8 sps:$4 sm:$0xff]  }
  0x1b   :  { %331 = vmatprep.subr.bf16.mxu1 %v456_v12  ;;  %v483_v30 = vld [vmem:[#allocation3 + $0xb4] ss:$8 sps:$4 sm:$0xff]   ;;  %v485_v31 = vld [vmem:[#allocation3 + $0xb0] ss:$8 sps:$4 sm:$0xff]   ;;  %v486_v32 = vld [vmem:[#allocation3 + $0xc4] ss:$8 sps:$4 sm:$0xff]  }
  0x1c   :  { %v488_v33 = vld [vmem:[#allocation3 + $0xc0] ss:$8 sps:$4 sm:$0xff]   ;;  %v489_v34 = vld [vmem:[#allocation3 + $0xd4] ss:$8 sps:$4 sm:$0xff]   ;;  %v491_v35 = vld [vmem:[#allocation3 + $0xd0] ss:$8 sps:$4 sm:$0xff]  }
  0x1d   :  { %v492_v36 = vld [vmem:[#allocation3 + $0xe4] ss:$8 sps:$4 sm:$0xff]   ;;  %v494_v37 = vld [vmem:[#allocation3 + $0xe0] ss:$8 sps:$4 sm:$0xff]   ;;  %v495_v38 = vld [vmem:[#allocation3 + $0xf4] ss:$8 sps:$4 sm:$0xff]  }
  0x1e   :  { %332 = vmatpush1.bf16.msra.mxu1 %v458_v13  ;;  %v497_v39 = vld [vmem:[#allocation3 + $0xf0] ss:$8 sps:$4 sm:$0xff]   ;;  %v50_v42 = vsub.s32 0, %v49_v41  ;;  %v46_v43 = vld [vmem:[%s607_s2] sm:$0x3]  ;;  %v54_v44 = vsub.s32 1, %v49_v41 }
  0x1f   :  { %333 = vmatprep.subr.bf16.mxu1 %v459_v14  ;;  %v155_v61 = vld [vmem:[%s609_s4] sm:$0x3]  ;;  %vm400_vm2 = vcmask 7168  }
  0x20   :  { %v51_v45 = vrot.slane %v46_v43, %v50_v42  ;;  %v55_v46 = vrot.slane %v46_v43, %v54_v44  ;;  %v160_v62 = vrot.slane %v155_v61, %v50_v42  ;;  %v164_v63 = vrot.slane %v155_v61, %v54_v44  ;;  %v374_v0 = vld [vmem:[%s610_s5] sm:$0x3] }
  0x21   :  { %v379_v4 = vrot.slane %v374_v0, %v50_v42  ;;  %v383_v7 = vrot.slane %v374_v0, %v54_v44 }
  0x22   :  { %334 = vmatpush1.bf16.msra.mxu1 %v461_v15 }
  0x23   :  { %335 = vmatprep.subr.bf16.mxu1 %v462_v16 }
  0x26   :  { %336 = vmatpush1.bf16.msra.mxu1 %v464_v17 }
  0x27   :  { %337 = vmatprep.subr.bf16.mxu1 %v465_v18 }
  0x2a   :  { %338 = vmatpush1.bf16.msra.mxu1 %v467_v19 }
  0x2b   :  { %339 = vmatprep.subr.bf16.mxu1 %v468_v20 }
  0x2e   :  { %340 = vmatpush1.bf16.msra.mxu1 %v470_v21  ;;  %v397_v21 = vstv %s611_s6 }
  0x2f   :  { %341 = vmatprep.subr.bf16.mxu1 %v471_v22 }
  0x32   :  { %342 = vmatpush1.bf16.msra.mxu1 %v473_v23 }
  0x33   :  { %343 = vmatprep.subr.bf16.mxu1 %v474_v24 }
  0x36   :  { %344 = vmatpush1.bf16.msra.mxu1 %v476_v25 }
  0x37   :  { %345 = vmatprep.subr.bf16.mxu1 %v477_v26 }
  0x3a   :  { %346 = vmatpush1.bf16.msra.mxu1 %v479_v27 }
  0x3b   :  { %347 = vmatprep.subr.bf16.mxu1 %v480_v28 }
  0x3e   :  { %348 = vmatpush1.bf16.msra.mxu1 %v482_v29 }
  0x3f   :  { %349 = vmatprep.subr.bf16.mxu1 %v483_v30 }
  0x42   :  { %350 = vmatpush1.bf16.msra.mxu1 %v485_v31 }
  0x43   :  { %351 = vmatprep.subr.bf16.mxu1 %v486_v32 }
  0x46   :  { %352 = vmatpush1.bf16.msra.mxu1 %v488_v33 }
  0x47   :  { %353 = vmatprep.subr.bf16.mxu1 %v489_v34 }
  0x4a   :  { %354 = vmatpush1.bf16.msra.mxu1 %v491_v35 }
  0x4b   :  { %355 = vmatprep.subr.bf16.mxu1 %v492_v36 }
  0x4e   :  { %356 = vmatpush1.bf16.msra.mxu1 %v494_v37 }
  0x4f   :  { %357 = vmatprep.subr.bf16.mxu1 %v495_v38 }
  0x52   :  { %358 = vmatpush1.bf16.msra.mxu1 %v497_v39 }
  0xec   :  { %v108_v47 = vpop.f32.mrb[0].mxu0 }
  0xed   :  { %v109_v48 = vadd.f32 %v108_v47, %v51_v45  ;;  %v110_v49 = vpop.f32.mrb[1].mxu0 }
  0xee   :  { %v111_v50 = vadd.f32 %v110_v49, %v55_v46  ;;  %v112_v51 = vpop.f32.mrb[2].mxu0 }
  0xef   :  { %v113_v52 = vadd.f32 %v112_v51, %v51_v45  ;;  %v114_v53 = vpop.f32.mrb[3].mxu0  ;;  %v117_v55 = vmax.f32 %v109_v48, 0.0 }
  0xf0   :  { %v115_v54 = vadd.f32 %v114_v53, %v55_v46  ;;  %v118_v57 = vmax.f32 %v111_v50, 0.0 }
  0xf1   :  { %v119_v56 = vmax.f32 %v113_v52, 0.0 }
  0xf2   :  { %v120_v58 = vmax.f32 %v115_v54, 0.0 }
  0xf3   :  { %v121_v59 = vpack.c.bf16 %v119_v56, %v117_v55 }
  0xf4   :  { %v122_v60 = vpack.c.bf16 %v120_v58, %v118_v57 }
  0xf6   :  { %359 = vmatprep.mubr.bf16.mxu1 %v122_v60 }
  0xf7   :  { %360 = vmatmul.mubr.bf16.vlgmr.msra.gmra.mrb[0].mxu1 %v121_v59 }
 0x1ca   :  { %v361_v1 = vpop.f32.mrb[0].mxu1 }
 0x1cb   :  { %v362_v2 = vadd.f32 %v361_v1, %v160_v62  ;;  %v363_v3 = vpop.f32.mrb[1].mxu1 }
 0x1cc   :  { %v364_v5 = vadd.f32 %v363_v3, %v164_v63  ;;  %v365_v6 = vpop.f32.mrb[2].mxu1 }
 0x1cd   :  { %v370_v8 = vmax.f32 %v362_v2, 0.0  ;;  %v366_v9 = vadd.f32 %v365_v6, %v160_v62  ;;  %v367_v10 = vpop.f32.mrb[3].mxu1 }
 0x1ce   :  { %v371_v11 = vmax.f32 %v364_v5, 0.0  ;;  %v368_v12 = vadd.f32 %v367_v10, %v164_v63 }
 0x1cf   :  { %v372_v13 = vmax.f32 %v366_v9, 0.0  ;;  %v386_v14 = vmul.f32 %v379_v4, %v370_v8 }
 0x1d0   :  { %v373_v15 = vmax.f32 %v368_v12, 0.0  ;;  %v387_v16 = vmul.f32 %v383_v7, %v371_v11 }
 0x1d1   :  { %v388_v17 = vmul.f32 %v379_v4, %v372_v13 }
 0x1d2   :  { %v389_v18 = vmul.f32 %v383_v7, %v373_v15  ;;  %v390_v19 = vadd.f32 %v387_v16, %v386_v14 }
 0x1d4   :  { %391 = vadd.xlane.f32.xlu0 %v390_v19  ;;  %v393_v20 = vadd.f32 %v389_v18, %v388_v17 }
 0x1d8   :  { %394 = vadd.xlane.f32.xlu0 %v393_v20 }
 0x261   :  { %v392_v22 = vpop.xlane.xlu0 %391 }
 0x262   :  { %v398_v23 = vadd.f32 %v397_v21, %v392_v22 }
 0x264   :  { %401 = vst.msk [vmem:[%s612_s7] sm:$0xff] %vm400_vm2, %v398_v23 }
 0x265   :  { %v395_v24 = vpop.xlane.xlu0 %394 }
 0x266   :  { %v399_v25 = vadd.f32 %v397_v21, %v395_v24 }
 0x268   :  { %402 = vst.msk [vmem:[%s612_s7 + $0x8] sm:$0xff] %vm400_vm2, %v399_v25 }
 0x269   :  { %407 = vsyncpa [#allocation4], 1 }

</bundles_post_ra>
